<compile_context>
chip_gen: v6e
topology: v6e:2x2x1
jax: 0.10.0
libtpu: 0.0.40
codegen_flags: <defaults>
</compile_context>

<pallas_src>
import jax
import jax.numpy as jnp
from jax.experimental import pallas as pl
from jax.experimental.pallas import tpu as pltpu

_PREC = jax.lax.Precision.HIGHEST


def _round_up(a, m):
    return (a + m - 1) // m * m


def items_feature_kernel(idx_ref, t1_ref, w2_ref, b2_ref, o_ref):
    idx = idx_ref[...]                                       # [tm, 1] int32
    tm = idx.shape[0]
    V = t1_ref.shape[0]

    # Embedding gather + first Linear fused as a single one-hot MXU matmul.
    # TODO(synk): for large V, replace the one-hot with a DMA row gather.
    iota = jax.lax.broadcasted_iota(jnp.int32, (tm, V), 1)
    onehot = (iota == idx).astype(jnp.float32)               # [tm, V]
    h = jnp.dot(onehot, t1_ref[...], precision=_PREC,
                preferred_element_type=jnp.float32)          # [tm, H]
    h = jnp.maximum(h, 0.0)

    out = jnp.dot(h, w2_ref[...], precision=_PREC,
                  preferred_element_type=jnp.float32) + b2_ref[...]
    # NOTE: out_dim (32) < 128 lanes -> masked stores; negligible at these shapes.
    o_ref[...] = jnp.maximum(out, 0.0).astype(o_ref.dtype)


def items_feature_extractor(x, emb_table, w1, b1, w2, b2, *,
                            n_types, n_states, tm=None):
    # idx computed in the wrapper (feedback: avoid [B,3] padded tile + column slices).
    idx = (x[:, 0] + x[:, 1] * n_types
           + x[:, 2] * (n_types * n_states)).astype(jnp.int32)
    B = idx.shape[0]

    # Fused table: T1 = emb_table @ w1 + b1  ([V, H]); exact for in-range indices.
    t1 = jnp.dot(emb_table, w1, precision=_PREC,
                 preferred_element_type=jnp.float32) + b1

    V, H = t1.shape
    O = w2.shape[1]

    if tm is None:
        tm = min(512, _round_up(B, 8))          # sublane-aligned batch tile
    Bp = _round_up(B, tm)

    idx2 = idx.reshape(B, 1)
    if Bp != B:
        idx2 = jnp.pad(idx2, ((0, Bp - B), (0, 0)))

    cost = pl.CostEstimate(
        flops=2 * Bp * (V * H + H * O),
        transcendentals=0,
        bytes_accessed=4 * (Bp + V * H + H * O + O + Bp * O),
    )

    out = pl.pallas_call(
        items_feature_kernel,
        out_shape=jax.ShapeDtypeStruct((Bp, O), jnp.float32),
        grid_spec=pltpu.PrefetchScalarGridSpec(
            num_scalar_prefetch=0,
            grid=(Bp // tm,),
            in_specs=[
                pl.BlockSpec((tm, 1), lambda i: (i, 0)),   # idx tile
                pl.BlockSpec((V, H), lambda i: (0, 0)),    # fused table (resident)
                pl.BlockSpec((H, O), lambda i: (0, 0)),    # w2 (resident)
                pl.BlockSpec((1, O), lambda i: (0, 0)),    # b2 (resident)
            ],
            out_specs=pl.BlockSpec((tm, O), lambda i: (i, 0)),
        ),
        compiler_params=pltpu.CompilerParams(
            dimension_semantics=("parallel",)),
        cost_estimate=cost,
    )(idx2, t1, w2, b2)
    return out[:B]


def reference(x, emb_table, w1, b1, w2, b2, *, n_types, n_states):
    idx = x[:, 0] + x[:, 1] * n_types + x[:, 2] * (n_types * n_states)
    emb = emb_table[idx]
    h = jnp.maximum(jnp.dot(emb, w1, precision=_PREC) + b1, 0.0)
    return jnp.maximum(jnp.dot(h, w2, precision=_PREC) + b2, 0.0)


def _make_inputs(key, B, n_types, n_states, n_colors):
    xt = jax.random.randint(key, (B, 1), 0, n_types, jnp.int32)
    xs = jax.random.randint(jax.random.fold_in(key, 1), (B, 1), 0, n_states, jnp.int32)
    xc = jax.random.randint(jax.random.fold_in(key, 2), (B, 1), 0, n_colors, jnp.int32)
    return jnp.concatenate([xt, xs, xc], axis=1)


if __name__ == "__main__":
    # Module config (synthetic, deterministic)
    n_types, n_states, n_colors = 4, 3, 2
    V = n_types * n_states * n_colors           # embedding vocabulary
    embedding_dim = 32
    layers = [64, 32]                           # config['layers']

    key = jax.random.PRNGKey(0)
    k_emb, k_w1, k_b1, k_w2, k_b2, k_x = jax.random.split(key, 6)

    emb_table = jax.random.normal(k_emb, (V, embedding_dim), jnp.float32) * 0.1
    w1 = jax.random.normal(k_w1, (embedding_dim, layers[0]), jnp.float32) * 0.1
    b1 = jax.random.normal(k_b1, (1, layers[0]), jnp.float32) * 0.1
    w2 = jax.random.normal(k_w2, (layers[0], layers[1]), jnp.float32) * 0.1
    b2 = jax.random.normal(k_b2, (1, layers[1]), jnp.float32) * 0.1

    # Case 1: small batch (single grid step)
    B = 8
    x = _make_inputs(k_x, B, n_types, n_states, n_colors)
    out = items_feature_extractor(x, emb_table, w1, b1, w2, b2,
                                  n_types=n_types, n_states=n_states)
    out = jax.block_until_ready(out)
    ref = reference(x, emb_table, w1, b1, w2, b2,
                    n_types=n_types, n_states=n_states)
    assert out.shape == (B, layers[-1])
    assert jnp.allclose(out, ref, atol=1e-5, rtol=1e-5)

    # Case 2: batch not a multiple of the tile (exercises padding + grid plumbing)
    B2 = 20
    x2 = _make_inputs(jax.random.fold_in(k_x, 7), B2, n_types, n_states, n_colors)
    out2 = items_feature_extractor(x2, emb_table, w1, b1, w2, b2,
                                   n_types=n_types, n_states=n_states, tm=8)
    out2 = jax.block_until_ready(out2)
    ref2 = reference(x2, emb_table, w1, b1, w2, b2,
                     n_types=n_types, n_states=n_states)
    assert out2.shape == (B2, layers[-1])
    assert jnp.allclose(out2, ref2, atol=1e-5, rtol=1e-5)

    print("KERNEL_OK")
</pallas_src>

<mosaic_0001>
module attributes {stable_mosaic.version = 11 : i64} {
  func.func @items_feature_kernel(%arg0: i32, %arg1: memref<8x1xi32, #tpu.memory_space<vmem>>, %arg2: memref<24x64xf32, #tpu.memory_space<vmem>>, %arg3: memref<64x32xf32, #tpu.memory_space<vmem>>, %arg4: memref<1x32xf32, #tpu.memory_space<vmem>>, %arg5: memref<8x32xf32, #tpu.memory_space<vmem>>) attributes {dimension_semantics = [#tpu.dimension_semantics<parallel>], iteration_bounds = array<i64: 1>, scalar_prefetch = 0 : i64, scratch_operands = 0 : i64, tpu.core_type = #tpu.core_type<tc>, window_params = [{transform_indices = @transform_0, window_bounds = array<i64: 8, 1>}, {pipeline_mode = #tpu.pipeline_mode<synchronous>, transform_indices = @transform_1, window_bounds = array<i64: 24, 64>}, {pipeline_mode = #tpu.pipeline_mode<synchronous>, transform_indices = @transform_2, window_bounds = array<i64: 64, 32>}, {pipeline_mode = #tpu.pipeline_mode<synchronous>, transform_indices = @transform_3, window_bounds = array<i64: 1, 32>}, {transform_indices = @transform_4, window_bounds = array<i64: 8, 32>}]} {
    %c0 = arith.constant 0 : index
    %c0_0 = arith.constant 0 : index
    %0 = vector.load %arg1[%c0, %c0_0] : memref<8x1xi32, #tpu.memory_space<vmem>>, vector<8x1xi32>
    %1 = tpu.iota {dimensions = array<i32: 1>} : vector<8x24xi32>
    %2 = vector.broadcast %0 : vector<8x1xi32> to vector<8x24xi32>
    %3 = arith.cmpi eq, %1, %2 : vector<8x24xi32>
    %4 = arith.extui %3 : vector<8x24xi1> to vector<8x24xi32>
    %5 = arith.sitofp %4 : vector<8x24xi32> to vector<8x24xf32>
    %c0_1 = arith.constant 0 : index
    %c0_2 = arith.constant 0 : index
    %6 = vector.load %arg2[%c0_1, %c0_2] : memref<24x64xf32, #tpu.memory_space<vmem>>, vector<24x64xf32>
    %cst = arith.constant dense<0.000000e+00> : vector<8x64xf32>
    %7 = tpu.matmul %5, %6, %cst {dimension_numbers = #tpu.dot_dimension_numbers<[1], [0], [0], [1], [0, 0, 1, 1], [], []>, precision = #tpu.contract_precision<fp32>} : vector<8x24xf32>, vector<24x64xf32>, vector<8x64xf32> -> vector<8x64xf32>
    %cst_3 = arith.constant 0.000000e+00 : f32
    %8 = vector.broadcast %cst_3 : f32 to vector<8x64xf32>
    %9 = arith.maximumf %7, %8 : vector<8x64xf32>
    %c0_4 = arith.constant 0 : index
    %c0_5 = arith.constant 0 : index
    %10 = vector.load %arg3[%c0_4, %c0_5] : memref<64x32xf32, #tpu.memory_space<vmem>>, vector<64x32xf32>
    %cst_6 = arith.constant dense<0.000000e+00> : vector<8x32xf32>
    %11 = tpu.matmul %9, %10, %cst_6 {dimension_numbers = #tpu.dot_dimension_numbers<[1], [0], [0], [1], [0, 0, 1, 1], [], []>, precision = #tpu.contract_precision<fp32>} : vector<8x64xf32>, vector<64x32xf32>, vector<8x32xf32> -> vector<8x32xf32>
    %c0_7 = arith.constant 0 : index
    %c0_8 = arith.constant 0 : index
    %12 = vector.load %arg4[%c0_7, %c0_8] : memref<1x32xf32, #tpu.memory_space<vmem>>, vector<1x32xf32>
    %13 = vector.broadcast %12 : vector<1x32xf32> to vector<8x32xf32>
    %14 = arith.addf %11, %13 : vector<8x32xf32>
    %cst_9 = arith.constant 0.000000e+00 : f32
    %15 = vector.broadcast %cst_9 : f32 to vector<8x32xf32>
    %16 = arith.maximumf %14, %15 : vector<8x32xf32>
    %c0_10 = arith.constant 0 : index
    %c0_11 = arith.constant 0 : index
    %17 = vector.load %arg5[%c0_10, %c0_11] : memref<8x32xf32, #tpu.memory_space<vmem>>, vector<8x32xf32>
    tpu.vector_store %arg5[%c0_10, %c0_11], %16 {strides = array<i32>} : memref<8x32xf32, #tpu.memory_space<vmem>>, vector<8x32xf32>,
    return
  }
  func.func @transform_0(%arg0: i32) -> (i32, i32) {
    %c0_i32 = arith.constant 0 : i32
    %c0_i32_0 = arith.constant 0 : i32
    return %arg0, %c0_i32 : i32, i32
  }
  func.func @transform_1(%arg0: i32) -> (i32, i32) {
    %c0_i32 = arith.constant 0 : i32
    %c0_i32_0 = arith.constant 0 : i32
    %c0_i32_1 = arith.constant 0 : i32
    return %c0_i32, %c0_i32_0 : i32, i32
  }
  func.func @transform_2(%arg0: i32) -> (i32, i32) {
    %c0_i32 = arith.constant 0 : i32
    %c0_i32_0 = arith.constant 0 : i32
    %c0_i32_1 = arith.constant 0 : i32
    return %c0_i32, %c0_i32_0 : i32, i32
  }
  func.func @transform_3(%arg0: i32) -> (i32, i32) {
    %c0_i32 = arith.constant 0 : i32
    %c0_i32_0 = arith.constant 0 : i32
    %c0_i32_1 = arith.constant 0 : i32
    return %c0_i32, %c0_i32_0 : i32, i32
  }
  func.func @transform_4(%arg0: i32) -> (i32, i32) {
    %c0_i32 = arith.constant 0 : i32
    %c0_i32_0 = arith.constant 0 : i32
    return %arg0, %c0_i32 : i32, i32
  }
}

</mosaic_0001>

<bundles_post_ra>
// kernel: tpu_custom_call.1
= control target key start
LH: loop header
LB: loop body
LE: loop exit
PB: predicated region body
PF: predicated region fallthrough
CT: control target
= control target key end

     0   :  { %v1358_v3 = vmov 0   ;;  %v1359_v4 = vmov 0.0   ;;  %s1665_s0 = inlined_call_operand.vmem [shape: s32[8,1], index: 0, kind: input, shape index: {}]   ;;  %s1666_s1 = inlined_call_operand.vmem [shape: f32[24,64], index: 1, kind: input, shape index: {}]   ;;  %s1667_s2 = inlined_call_operand.vmem [shape: f32[64,32], index: 2, kind: input, shape index: {}]   ;;  %s1668_s3 = inlined_call_operand.vmem [shape: f32[1,32], index: 3, kind: input, shape index: {}]   ;;  %s1669_s4 = inlined_call_operand.hbm [shape: f32[8,32], index: 4, kind: output, shape index: {}]  }
   0x1   :  { %v18_v0 = vld [vmem:[%s1665_s0] sm:$0xff]  ;;  %v29_v1 = vld [vmem:[%s1666_s1 + $0x10] sm:$0xff]  ;;  %v28_v2 = vld [vmem:[%s1666_s1 + $0x8] sm:$0xff]  ;;  %1335 = vset.pattern.permute.xlu0 %v1358_v3  ;;  %1172 = vmatprep.subr.mxu1 %v1359_v4 }
   0x2   :  { %v61_v5 = vand.u32 4294901760, %v29_v1  ;;  %v64_v6 = vand.u32 4294901760, %v28_v2  ;;  %v27_v7 = vld [vmem:[%s1666_s1] sm:$0xff] }
   0x3   :  { %9 = vsyncpa [#allocation3], 0  ;;  %22 = vperm.xlu0 %1335, %v18_v0   ;;  %v67_v8 = vand.u32 4294901760, %v27_v7  ;;  %vm1360_vm0 = vmmov 0   ;;  %1163 = vmatprep.subr.mxu0 %v1359_v4  ;;  %v19_v21 = vlaneseq  ;;  %vm30_vm1 = vcmask 195584   ;;  %v514_v30 = vld [vmem:[%s1667_s2 + $0x38] sm:$0xff] }
   0x4   :  { %1178 = vmatprep.mubr.msk.f32.mxu1 %vm1360_vm0, %v1359_v4  ;;  %v1402_v9 = vsub.f32 %v29_v1, %v61_v5  ;;  %v1404_v10 = vsub.f32 %v28_v2, %v64_v6  ;;  %1169 = vmatprep.mubr.msk.f32.mxu0 %vm1360_vm0, %v1359_v4  ;;  %v1458_v31 = vand.u32 4294901760, %v514_v30  ;;  %v513_v32 = vld [vmem:[%s1667_s2 + $0x30] sm:$0xff]  ;;  %v512_v35 = vld [vmem:[%s1667_s2 + $0x28] sm:$0xff]  ;;  %v511_v39 = vld [vmem:[%s1667_s2 + $0x20] sm:$0xff]  ;;  %vm522_vm3 = vcmask 523264   ;;  %s1361_s12 = smov [#allocation2]  }
   0x5   :  { %v1409_v11 = vsub.f32 %v27_v7, %v67_v8  ;;  %1164 = vmatpush3.msra.mxu0 %v61_v5  ;;  %v20_v22 = vand.u32 127, %v19_v21  ;;  %v1466_v34 = vand.u32 4294901760, %v513_v32  ;;  %v1477_v38 = vand.u32 4294901760, %v512_v35  ;;  %v510_v44 = vld [vmem:[%s1667_s2 + $0x18] sm:$0xff]  ;;  %v509_v50 = vld [vmem:[%s1667_s2 + $0x10] sm:$0xff]  ;;  %v508_v56 = vld [vmem:[%s1667_s2 + $0x8] sm:$0xff] }
   0x6   :  { %v141_v12 = vand.u32 4294901760, %v1402_v9  ;;  %v148_v13 = vand.u32 4294901760, %v1404_v10  ;;  %1165 = vmatprep.subr.mxu0 %v1359_v4  ;;  %v1464_v33 = vsub.f32 %v514_v30, %v1458_v31  ;;  %v1491_v43 = vand.u32 4294901760, %v511_v39  ;;  %v507_v62 = vld [vmem:[%s1667_s2] sm:$0xff]  ;;  %s1072_s13 = sshll.u32 %s1361_s12, 4  ;;  %s1073_s13 = int_to_ptr.vmem [resolvable:$true] %s1072_s13 }
   0x7   :  { %v155_v14 = vand.u32 4294901760, %v1409_v11  ;;  %1166 = vmatpush3.msra.mxu0 %v64_v6  ;;  %v1475_v37 = vsub.f32 %v513_v32, %v1466_v34  ;;  %v1489_v42 = vsub.f32 %v512_v35, %v1477_v38  ;;  %v1506_v49 = vand.u32 4294901760, %v510_v44  ;;  %s1336_s14 = scalar_lea.vmem %s1073_s13, 128  ;;  %p1341_p1 = scmp.lt.s32.totalorder %s1073_s13, %s1073_s13 }
   0x8   :  { %v142_v15 = vsub.f32 %v1402_v9, %v141_v12  ;;  %v149_v16 = vsub.f32 %v1404_v10, %v148_v13  ;;  %1167 = vmatprep.subr.mxu0 %v1359_v4  ;;  %v628_v36 = vand.u32 4294901760, %v1464_v33  ;;  %v1503_v48 = vsub.f32 %v511_v39, %v1491_v43  ;;  %p1337_p0 = scmp.ne.s32.totalorder %s1073_s13, %s1336_s14  ;;  %p1342_p2 = scmp.lt.s32.totalorder %s1336_s14, %s1336_s14 }
   0x9   :  { %v156_v17 = vsub.f32 %v1409_v11, %v155_v14  ;;  %1168 = vmatpush3.msra.mxu0 %v67_v8  ;;  %v635_v41 = vand.u32 4294901760, %v1475_v37  ;;  %v642_v47 = vand.u32 4294901760, %v1489_v42  ;;  %v1516_v54 = vand.u32 4294901760, %v509_v50 }
   0xa   :  { %v143_v18 = vand.u32 4294901760, %v142_v15  ;;  %v150_v19 = vand.u32 4294901760, %v149_v16  ;;  %1181 = vmatprep.subr.mxu0 %v1359_v4  ;;  %v629_v40 = vsub.f32 %v1464_v33, %v628_v36  ;;  %v649_v53 = vand.u32 4294901760, %v1503_v48  ;;  %p1343_p3 = por %p1342_p2, %p1341_p1 }
   0xb   :  { %v157_v20 = vand.u32 4294901760, %v156_v17  ;;  %v636_v46 = vsub.f32 %v1475_v37, %v635_v41  ;;  %v643_v52 = vsub.f32 %v1489_v42, %v642_v47  ;;  %v1520_v55 = vsub.f32 %v510_v44, %v1506_v49 }
   0xc   :  { %1173 = vmatpush3.msra.mxu1 %v143_v18  ;;  %v630_v45 = vand.u32 4294901760, %v629_v40  ;;  %v650_v58 = vsub.f32 %v1503_v48, %v649_v53  ;;  %v1530_v59 = vsub.f32 %v509_v50, %v1516_v54  ;;  %v1532_v60 = vand.u32 4294901760, %v508_v56  ;;  %p1344_p4 = pnand %p1343_p3, %p1337_p0 }
   0xd   :  { %1174 = vmatprep.subr.mxu1 %v1359_v4  ;;  %v637_v51 = vand.u32 4294901760, %v636_v46  ;;  %v644_v57 = vand.u32 4294901760, %v643_v52  ;;  %v656_v61 = vand.u32 4294901760, %v1520_v55  ;;  %v1545_v2 = vand.u32 4294901760, %v507_v62 }
   0xe   :  { %1175 = vmatpush3.msra.mxu1 %v150_v19  ;;  %v651_v63 = vand.u32 4294901760, %v650_v58  ;;  %v663_v0 = vand.u32 4294901760, %v1530_v59  ;;  %v1543_v1 = vsub.f32 %v508_v56, %v1532_v60  ;;  %vm1064_vm4 = vcmask 261120  }
   0xf   :  { %1176 = vmatprep.subr.mxu1 %v1359_v4  ;;  %v657_v3 = vsub.f32 %v1520_v55, %v656_v61  ;;  %v1558_v7 = vsub.f32 %v507_v62, %v1545_v2 }
  0x10   :  { %1177 = vmatpush3.msra.mxu1 %v157_v20 }
  0x11   :  { %1190 = vmatprep.subr.mxu1 %v1359_v4 }
  0x7e   :  { %v23_v23 = vpop.permute.xlu0 %22 }
  0x7f   :  { %vm24_vm2 = vcmp.eq.s32.totalorder %v20_v22, %v23_v23 }
  0x80   :  { %v1080_v24 = vsel %vm24_vm2, 1.0, %v1359_v4 }
  0x81   :  { %v32_v25 = vsel %vm30_vm1, %v1080_v24, 0  ;;  %1179 = vmatmul.mubr.msk.f32.vlgmr.msra.gmra.mxu1 %vm30_vm1, %v1080_v24 }
  0x82   :  { %v103_v26 = vsub.f32 %v32_v25, %v32_v25  ;;  %1191 = vmatpush3.msra.mxu1 %v61_v5  ;;  %1196 = vmatprep.mubr.msk.f32.mxu1 %vm1360_vm0, %v1359_v4 }
  0x83   :  { %1192 = vmatprep.subr.mxu1 %v1359_v4 }
  0x84   :  { %1193 = vmatpush3.msra.mxu1 %v64_v6  ;;  %v104_v27 = vand.u32 4294901760, %v103_v26 }
  0x85   :  { %1194 = vmatprep.subr.mxu1 %v1359_v4 }
  0x86   :  { %1195 = vmatpush3.msra.mxu1 %v67_v8  ;;  %v105_v28 = vsub.f32 %v103_v26, %v104_v27 }
  0x87   :  { %1197 = vmatmul.mubr.f32.vlgmr.msra.gmra.mxu1 %v104_v27  ;;  %1208 = vmatprep.subr.mxu1 %v1359_v4 }
  0x88   :  { %1209 = vmatpush3.msra.mxu1 %v61_v5  ;;  %v106_v29 = vand.u32 4294901760, %v105_v28  ;;  %1214 = vmatprep.mubr.msk.f32.mxu1 %vm1360_vm0, %v1359_v4  ;;  %v664_v5 = vsub.f32 %v1530_v59, %v663_v0 }
  0x89   :  { %1210 = vmatprep.subr.mxu1 %v1359_v4 }
  0x8a   :  { %1211 = vmatpush3.msra.mxu1 %v64_v6  ;;  %1170 = vmatmul.mubr.f32.vlgmr.msra.gmra.mxu0 %v106_v29  ;;  %v670_v6 = vand.u32 4294901760, %v1543_v1 }
  0x8b   :  { %1182 = vmatpush3.msra.mxu0 %v1402_v9  ;;  %1212 = vmatprep.subr.mxu1 %v1359_v4  ;;  %v665_v9 = vand.u32 4294901760, %v664_v5 }
  0x8c   :  { %1183 = vmatprep.subr.mxu0 %v1359_v4  ;;  %1213 = vmatpush3.msra.mxu1 %v67_v8  ;;  %v658_v8 = vand.u32 4294901760, %v657_v3 }
  0x8d   :  { %1184 = vmatpush3.msra.mxu0 %v1404_v10  ;;  %1215 = vmatmul.mubr.msk.f32.vlgmr.msra.gmra.mxu1 %vm30_vm1, %v1080_v24  ;;  %v671_v10 = vsub.f32 %v1543_v1, %v670_v6 }
  0x8e   :  { %1185 = vmatprep.subr.mxu0 %v1359_v4  ;;  %1187 = vmatprep.mubr.msk.f32.mxu0 %vm1360_vm0, %v1359_v4 }
  0x8f   :  { %1186 = vmatpush3.msra.mxu0 %v1409_v11  ;;  %1236 = vmatprep.subr.mxu1 %v1359_v4  ;;  %v677_v11 = vand.u32 4294901760, %v1558_v7 }
  0x90   :  { %1188 = vmatmul.mubr.f32.vlgmr.msra.gmra.mxu0 %v103_v26  ;;  %1199 = vmatprep.subr.mxu0 %v1359_v4 }
  0x91   :  { %1200 = vmatpush3.msra.mxu0 %v141_v12  ;;  %1205 = vmatprep.mubr.msk.f32.mxu0 %vm1360_vm0, %v1359_v4  ;;  %v672_v12 = vand.u32 4294901760, %v671_v10 }
  0x92   :  { %1201 = vmatprep.subr.mxu0 %v1359_v4  ;;  %1252 = vmatprep.mubr.msk.f32.mxu1 %vm1360_vm0, %v1359_v4 }
  0x93   :  { %1202 = vmatpush3.msra.mxu0 %v148_v13  ;;  %1237 = vmatpush3.msra.mxu1 %v630_v45  ;;  %v678_v13 = vsub.f32 %v1558_v7, %v677_v11 }
  0x94   :  { %1203 = vmatprep.subr.mxu0 %v1359_v4  ;;  %1238 = vmatprep.subr.mxu1 %v1359_v4 }
  0x95   :  { %1204 = vmatpush3.msra.mxu0 %v155_v14  ;;  %1239 = vmatpush3.msra.mxu1 %v637_v51  ;;  %v679_v14 = vand.u32 4294901760, %v678_v13 }
  0x96   :  { %1206 = vmatmul.mubr.msk.f32.vlgmr.msra.gmra.mxu0 %vm30_vm1, %v1080_v24  ;;  %1217 = vmatprep.subr.mxu0 %v1359_v4 }
  0x97   :  { %1233 = vmatprep.mubr.msk.f32.mxu0 %vm1360_vm0, %v1359_v4  ;;  %1218 = vmatpush3.msra.mxu0 %v1458_v31 }
  0x98   :  { %1219 = vmatprep.subr.mxu0 %v1359_v4  ;;  %1240 = vmatprep.subr.mxu1 %v1359_v4 }
  0x99   :  { %1220 = vmatpush3.msra.mxu0 %v1466_v34  ;;  %1241 = vmatpush3.msra.mxu1 %v644_v57 }
  0x9a   :  { %1221 = vmatprep.subr.mxu0 %v1359_v4  ;;  %1242 = vmatprep.subr.mxu1 %v1359_v4 }
  0x9b   :  { %1222 = vmatpush3.msra.mxu0 %v1477_v38  ;;  %1243 = vmatpush3.msra.mxu1 %v651_v63 }
  0x9c   :  { %1223 = vmatprep.subr.mxu0 %v1359_v4  ;;  %1244 = vmatprep.subr.mxu1 %v1359_v4 }
  0x9d   :  { %1224 = vmatpush3.msra.mxu0 %v1491_v43  ;;  %1245 = vmatpush3.msra.mxu1 %v658_v8 }
  0x9e   :  { %1225 = vmatprep.subr.mxu0 %v1359_v4  ;;  %1246 = vmatprep.subr.mxu1 %v1359_v4 }
  0x9f   :  { %1226 = vmatpush3.msra.mxu0 %v1506_v49  ;;  %1247 = vmatpush3.msra.mxu1 %v665_v9 }
  0xa0   :  { %1227 = vmatprep.subr.mxu0 %v1359_v4  ;;  %1248 = vmatprep.subr.mxu1 %v1359_v4 }
  0xa1   :  { %1228 = vmatpush3.msra.mxu0 %v1516_v54  ;;  %1249 = vmatpush3.msra.mxu1 %v672_v12 }
  0xa2   :  { %1229 = vmatprep.subr.mxu0 %v1359_v4  ;;  %1250 = vmatprep.subr.mxu1 %v1359_v4 }
  0xa3   :  { %1230 = vmatpush3.msra.mxu0 %v1532_v60  ;;  %1251 = vmatpush3.msra.mxu1 %v679_v14 }
  0xa4   :  { %1231 = vmatprep.subr.mxu0 %v1359_v4  ;;  %1274 = vmatprep.subr.mxu1 %v1359_v4 }
  0xa5   :  { %1232 = vmatpush3.msra.mxu0 %v1545_v2 }
  0xa6   :  { %1255 = vmatprep.subr.mxu0 %v1359_v4 }
 0x141   :  { %v194_v15 = vpop.f32.mrf.mxu1 }
 0x143   :  { %v1180_v16 = vpop.f32.mrf.mxu1 }
 0x147   :  { %v348_v17 = vpop.f32.mrf.mxu1 }
 0x149   :  { %v1198_v18 = vpop.f32.mrf.mxu1 }
 0x14a   :  { %v108_v19 = vpop.f32.mrf.mxu0 }
 0x14b   :  { %v195_v22 = vadd.f32 %v194_v15, %v108_v19 }
 0x14c   :  { %v1171_v20 = vpop.f32.mrf.mxu0 }
 0x14d   :  { %v502_v21 = vpop.f32.mrf.mxu1 }
 0x14f   :  { %v1216_v23 = vpop.f32.mrf.mxu1 }
 0x150   :  { %v272_v24 = vpop.f32.mrf.mxu0 }
 0x151   :  { %v273_v25 = vadd.f32 %v272_v24, %v195_v22 }
 0x152   :  { %v1189_v26 = vpop.f32.mrf.mxu0 }
 0x153   :  { %v349_v27 = vadd.f32 %v348_v17, %v273_v25 }
 0x156   :  { %v428_v28 = vpop.f32.mrf.mxu0 }
 0x157   :  { %v429_v29 = vadd.f32 %v428_v28, %v349_v27 }
 0x158   :  { %v1207_v30 = vpop.f32.mrf.mxu0 }
 0x159   :  { %v503_v32 = vadd.f32 %v502_v21, %v429_v29 }
 0x15b   :  { %v506_v35 = vmax.f32 %v503_v32, 0.0 }
 0x15d   :  { %v524_v39 = vsel %vm522_vm3, %v506_v35, 0 }
 0x15e   :  { %v1575_v40 = vand.u32 4294901760, %v524_v39 }
 0x160   :  { %v600_v44 = vsub.f32 %v524_v39, %v1575_v40  ;;  %1253 = vmatmul.mubr.f32.vlgmr.msra.gmra.mxu1 %v1575_v40 }
 0x161   :  { %1275 = vmatpush3.msra.mxu1 %v1458_v31  ;;  %1290 = vmatprep.mubr.msk.f32.mxu1 %vm1360_vm0, %v1359_v4 }
 0x162   :  { %1276 = vmatprep.subr.mxu1 %v1359_v4  ;;  %v601_v45 = vand.u32 4294901760, %v600_v44 }
 0x163   :  { %1277 = vmatpush3.msra.mxu1 %v1466_v34 }
 0x164   :  { %1278 = vmatprep.subr.mxu1 %v1359_v4  ;;  %v602_v46 = vsub.f32 %v600_v44, %v601_v45 }
 0x165   :  { %1279 = vmatpush3.msra.mxu1 %v1477_v38 }
 0x166   :  { %1280 = vmatprep.subr.mxu1 %v1359_v4  ;;  %v603_v50 = vand.u32 4294901760, %v602_v46 }
 0x167   :  { %1281 = vmatpush3.msra.mxu1 %v1491_v43 }
 0x168   :  { %1282 = vmatprep.subr.mxu1 %v1359_v4  ;;  %1234 = vmatmul.mubr.f32.vlgmr.msra.gmra.mxu0 %v603_v50 }
 0x169   :  { %1256 = vmatpush3.msra.mxu0 %v1464_v33  ;;  %1283 = vmatpush3.msra.mxu1 %v1506_v49 }
 0x16a   :  { %1257 = vmatprep.subr.mxu0 %v1359_v4  ;;  %1284 = vmatprep.subr.mxu1 %v1359_v4 }
 0x16b   :  { %1258 = vmatpush3.msra.mxu0 %v1475_v37  ;;  %1285 = vmatpush3.msra.mxu1 %v1516_v54 }
 0x16c   :  { %1259 = vmatprep.subr.mxu0 %v1359_v4  ;;  %1286 = vmatprep.subr.mxu1 %v1359_v4 }
 0x16d   :  { %1260 = vmatpush3.msra.mxu0 %v1489_v42  ;;  %1287 = vmatpush3.msra.mxu1 %v1532_v60 }
 0x16e   :  { %1261 = vmatprep.subr.mxu0 %v1359_v4  ;;  %1288 = vmatprep.subr.mxu1 %v1359_v4 }
 0x16f   :  { %1262 = vmatpush3.msra.mxu0 %v1503_v48  ;;  %1289 = vmatpush3.msra.mxu1 %v1545_v2 }
 0x170   :  { %1263 = vmatprep.subr.mxu0 %v1359_v4  ;;  %1291 = vmatmul.mubr.f32.vlgmr.msra.gmra.mxu1 %v601_v45 }
 0x171   :  { %1312 = vmatprep.subr.mxu1 %v1359_v4  ;;  %1264 = vmatpush3.msra.mxu0 %v1520_v55 }
 0x172   :  { %1313 = vmatpush3.msra.mxu1 %v1458_v31  ;;  %1265 = vmatprep.subr.mxu0 %v1359_v4 }
 0x173   :  { %1314 = vmatprep.subr.mxu1 %v1359_v4  ;;  %1266 = vmatpush3.msra.mxu0 %v1530_v59 }
 0x174   :  { %1315 = vmatpush3.msra.mxu1 %v1466_v34  ;;  %1267 = vmatprep.subr.mxu0 %v1359_v4 }
 0x175   :  { %1316 = vmatprep.subr.mxu1 %v1359_v4  ;;  %1268 = vmatpush3.msra.mxu0 %v1543_v1 }
 0x176   :  { %1317 = vmatpush3.msra.mxu1 %v1477_v38  ;;  %1269 = vmatprep.subr.mxu0 %v1359_v4 }
 0x177   :  { %1318 = vmatprep.subr.mxu1 %v1359_v4  ;;  %1270 = vmatpush3.msra.mxu0 %v1558_v7 }
 0x178   :  { %1271 = vmatprep.mubr.msk.f32.mxu0 %vm1360_vm0, %v1359_v4  ;;  %1319 = vmatpush3.msra.mxu1 %v1491_v43  ;;  %v1084_v43 = vld [vmem:[%s1668_s3] ss:$0 sm:$0xff] }
 0x179   :  { %1272 = vmatmul.mubr.f32.vlgmr.msra.gmra.mxu0 %v600_v44  ;;  %1293 = vmatprep.subr.mxu0 %v1359_v4 }
 0x17a   :  { %1320 = vmatprep.subr.mxu1 %v1359_v4  ;;  %1294 = vmatpush3.msra.mxu0 %v628_v36 }
 0x17b   :  { %1321 = vmatpush3.msra.mxu1 %v1506_v49  ;;  %1295 = vmatprep.subr.mxu0 %v1359_v4 }
 0x17c   :  { %1322 = vmatprep.subr.mxu1 %v1359_v4  ;;  %1296 = vmatpush3.msra.mxu0 %v635_v41 }
 0x17d   :  { %1323 = vmatpush3.msra.mxu1 %v1516_v54  ;;  %1297 = vmatprep.subr.mxu0 %v1359_v4 }
 0x17e   :  { %1324 = vmatprep.subr.mxu1 %v1359_v4  ;;  %1298 = vmatpush3.msra.mxu0 %v642_v47 }
 0x17f   :  { %1325 = vmatpush3.msra.mxu1 %v1532_v60  ;;  %1299 = vmatprep.subr.mxu0 %v1359_v4 }
 0x180   :  { %1326 = vmatprep.subr.mxu1 %v1359_v4  ;;  %1300 = vmatpush3.msra.mxu0 %v649_v53 }
 0x181   :  { %1327 = vmatpush3.msra.mxu1 %v1545_v2  ;;  %1328 = vmatprep.mubr.msk.f32.mxu1 %vm1360_vm0, %v1359_v4 }
 0x182   :  { %1301 = vmatprep.subr.mxu0 %v1359_v4  ;;  %1329 = vmatmul.mubr.f32.vlgmr.msra.gmra.mxu1 %v1575_v40 }
 0x183   :  { %1302 = vmatpush3.msra.mxu0 %v656_v61  ;;  %1309 = vmatprep.mubr.msk.f32.mxu0 %vm1360_vm0, %v1359_v4 }
 0x184   :  { %1303 = vmatprep.subr.mxu0 %v1359_v4 }
 0x185   :  { %1304 = vmatpush3.msra.mxu0 %v663_v0 }
 0x186   :  { %1305 = vmatprep.subr.mxu0 %v1359_v4 }
 0x187   :  { %1306 = vmatpush3.msra.mxu0 %v670_v6 }
 0x188   :  { %1307 = vmatprep.subr.mxu0 %v1359_v4 }
 0x189   :  { %1308 = vmatpush3.msra.mxu0 %v677_v11 }
 0x18a   :  { %1310 = vmatmul.mubr.f32.vlgmr.msra.gmra.mxu0 %v1575_v40 }
 0x220   :  { %v716_v31 = vpop.f32.mrf.mxu1 }
 0x222   :  { %v1254_v33 = vpop.f32.mrf.mxu1 }
 0x228   :  { %v605_v34 = vpop.f32.mrf.mxu0 }
 0x229   :  { %v606_v47 = vadd.f32 %v1084_v43, %v605_v34 }
 0x22a   :  { %v1235_v36 = vpop.f32.mrf.mxu0 }
 0x22b   :  { %v717_v4 = vadd.f32 %v716_v31, %v606_v47 }
 0x230   :  { %v885_v37 = vpop.f32.mrf.mxu1 }
 0x232   :  { %v1292_v38 = vpop.f32.mrf.mxu1 }
 0x239   :  { %v804_v41 = vpop.f32.mrf.mxu0 }
 0x23a   :  { %v805_v51 = vadd.f32 %v804_v41, %v717_v4 }
 0x23b   :  { %v1273_v42 = vpop.f32.mrf.mxu0 }
 0x23c   :  { %v886_v52 = vadd.f32 %v885_v37, %v805_v51 }
 0x242   :  { %v1059_v48 = vpop.f32.mrf.mxu1 }
 0x244   :  { %v1330_v49 = vpop.f32.mrf.mxu1 }
 0x24a   :  { %v980_v53 = vpop.f32.mrf.mxu0 }
 0x24b   :  { %v981_v54 = vadd.f32 %v980_v53, %v886_v52 }
 0x24c   :  { %v1311_v55 = vpop.f32.mrf.mxu0 }
 0x24d   :  { %v1060_v56 = vadd.f32 %v1059_v48, %v981_v54 }
 0x24f   :  { %v1063_v57 = vmax.f32 %v1060_v56, 0.0 }
 0x251   :  { %1065 = vst.msk [vmem:[#allocation2] sm:$0xff] %vm1064_vm4, %v1063_v57 }
 0x252   :  { %1347 = shalt.err (!%p1344_p4)
}
 0x253   :  { %1075 = dma.vmem_to_hbm [thread:$0]  %s1073_s13, 128, %s1669_s4, [#allocation3]  }
 0x254   :  { %1356 = dma.done.wait [#allocation3], 128  }
 0x255   :  { %1357 = vsyncadd [#allocation3], 4294967168 }
 0x256   :  { %1079 = vsyncpa [#allocation3], 1 }

</bundles_post_ra>
